<compile_context>
chip_gen: v7x
topology: tpu7x:2x2x1
jax: 0.10.0
libtpu: 0.0.40
codegen_flags: <defaults>
</compile_context>

<pallas_src>
import jax
import jax.numpy as jnp
from jax.experimental import pallas as pl
from jax.experimental.pallas import tpu as pltpu


def _round_up(x: int, m: int) -> int:
    return ((x + m - 1) // m) * m


def _residual_decoder_kernel(x_ref, w_ref, b_ref, o_ref):
    # x_ref : (TM, Dp)   w_ref : (TN, Dp)  (PyTorch layout: rows = out features)
    # b_ref : (1, TN)    o_ref : (TM, TN)
    tn = o_ref.shape[1]

    # y = x @ W^T : contract last dim of x with last dim of w on the MXU.
    y = jax.lax.dot_general(
        x_ref[...],
        w_ref[...],
        dimension_numbers=(((1,), (1,)), ((), ())),
        preferred_element_type=jnp.float32,
    )

    # Residual columns matching this output-column tile (square D -> D Linear).
    col0 = pl.multiple_of(pl.program_id(1) * tn, 128)
    x_cols = x_ref[:, pl.ds(col0, tn)]

    # f32 accumulate + residual + bias (VPU add promotes); one downcast at store.
    o_ref[...] = (y + x_cols + b_ref[...]).astype(o_ref.dtype)


def residual_decoder(x, weight, bias, *, tm_max=512, tn_max=2048):
    """x: (..., D); weight: (D, D) PyTorch Linear convention (out = x @ W^T + b)."""
    assert tm_max % 8 == 0 and tn_max >= 128
    orig_shape = x.shape
    D = orig_shape[-1]
    x2d = x.reshape(-1, D)
    M = x2d.shape[0]

    # --- tile sizes -----------------------------------------------------------
    Dp = _round_up(D, 128)                      # lane-dense feature dim
    if Dp <= tn_max:
        TN = Dp                                 # weight fits: no N tiling
    else:
        TN = 128
        for cand in (512, 256, 128):            # largest column tile <= tn_max
            if cand <= tn_max and Dp % cand == 0:
                TN = cand
                break
    TM = min(tm_max, _round_up(M, 8))           # row tile (multiple of 8)
    Mp = _round_up(M, TM)

    # --- pad to tile-friendly shapes (zero padding keeps the math exact) -------
    if (Mp, Dp) != (M, D):
        x2d = jnp.pad(x2d, ((0, Mp - M), (0, Dp - D)))
    w_p = weight if Dp == D else jnp.pad(weight, ((0, Dp - D), (0, Dp - D)))
    b_p = bias if Dp == D else jnp.pad(bias, (0, Dp - D))
    b_p = b_p.reshape(1, Dp)

    grid = (Mp // TM, Dp // TN)

    itemsize = jnp.dtype(x.dtype).itemsize
    cost = pl.CostEstimate(
        flops=2 * Mp * Dp * Dp + 2 * Mp * Dp,
        transcendentals=0,
        bytes_accessed=(2 * Mp * Dp + Dp * Dp + Dp) * itemsize,
    )

    # Per-step footprint (x tile + weight tile + bias + out tile), x2 for double
    # buffering + headroom; capped so it stays valid on every TPU generation.
    tile_bytes = (TM * Dp + TN * Dp + TN + TM * TN) * itemsize
    vmem_limit = int(min(100 * 1024 * 1024, max(32 * 1024 * 1024, 4 * tile_bytes)))

    out = pl.pallas_call(
        _residual_decoder_kernel,
        out_shape=jax.ShapeDtypeStruct((Mp, Dp), x.dtype),
        grid_spec=pltpu.PrefetchScalarGridSpec(
            num_scalar_prefetch=0,
            grid=grid,
            in_specs=[
                pl.BlockSpec((TM, Dp), lambda i, j: (i, 0)),   # x row tile
                pl.BlockSpec((TN, Dp), lambda i, j: (j, 0)),   # weight row tile (untransposed)
                pl.BlockSpec((1, TN), lambda i, j: (0, j)),    # bias column tile
            ],
            out_specs=pl.BlockSpec((TM, TN), lambda i, j: (i, j)),
        ),
        compiler_params=pltpu.CompilerParams(
            dimension_semantics=("parallel", "parallel"),
            vmem_limit_bytes=vmem_limit,
        ),
        cost_estimate=cost,
    )(x2d, w_p, b_p)

    if (Mp, Dp) != (M, D):
        out = out[:M, :D]
    return out.reshape(orig_shape)


if __name__ == "__main__":
    key = jax.random.PRNGKey(0)
    k_x, k_w, k_b, k_x2, k_w2, k_b2 = jax.random.split(key, 6)

    # --- test 1: module-sized small shapes (D padded 32 -> 128 internally) -----
    batch, seq, dim = 2, 8, 32
    x = jax.random.normal(k_x, (batch, seq, dim), dtype=jnp.float32)
    bound = 1.0 / (dim ** 0.5)
    weight = jax.random.uniform(k_w, (dim, dim), minval=-bound, maxval=bound,
                                dtype=jnp.float32)
    bias = jax.random.uniform(k_b, (dim,), minval=-bound, maxval=bound,
                              dtype=jnp.float32)

    out = residual_decoder(x, weight, bias)
    out = jax.block_until_ready(out)
    ref = x + jnp.einsum("bsd,od->bso", x, weight) + bias
    assert jnp.allclose(out, ref, atol=1e-5, rtol=1e-5), "mismatch vs reference (test 1)"

    # --- test 2: exercise the multi-tile (M and N tiled) path -------------------
    b2s, s2s, d2 = 3, 70, 256          # M=210 (padded to 256 rows), Dp=256
    x2 = jax.random.normal(k_x2, (b2s, s2s, d2), dtype=jnp.float32)
    bound2 = 1.0 / (d2 ** 0.5)
    w2 = jax.random.uniform(k_w2, (d2, d2), minval=-bound2, maxval=bound2,
                            dtype=jnp.float32)
    bb2 = jax.random.uniform(k_b2, (d2,), minval=-bound2, maxval=bound2,
                             dtype=jnp.float32)

    out2 = residual_decoder(x2, w2, bb2, tm_max=64, tn_max=128)  # grid (4, 2)
    out2 = jax.block_until_ready(out2)
    ref2 = x2 + jnp.einsum("bsd,od->bso", x2, w2) + bb2
    assert jnp.allclose(out2, ref2, atol=1e-4, rtol=1e-4), "mismatch vs reference (test 2)"

    print("KERNEL_OK")
</pallas_src>

<mosaic_0001>
module attributes {stable_mosaic.version = 11 : i64} {
  func.func @_residual_decoder_kernel(%arg0: i32, %arg1: i32, %arg2: memref<16x128xf32, #tpu.memory_space<vmem>>, %arg3: memref<128x128xf32, #tpu.memory_space<vmem>>, %arg4: memref<1x128xf32, #tpu.memory_space<vmem>>, %arg5: memref<16x128xf32, #tpu.memory_space<vmem>>) attributes {dimension_semantics = [#tpu.dimension_semantics<parallel>, #tpu.dimension_semantics<parallel>], iteration_bounds = array<i64: 1, 1>, scalar_prefetch = 0 : i64, scratch_operands = 0 : i64, tpu.core_type = #tpu.core_type<tc>, window_params = [{transform_indices = @transform_0, window_bounds = array<i64: 16, 128>}, {transform_indices = @transform_1, window_bounds = array<i64: 128, 128>}, {transform_indices = @transform_2, window_bounds = array<i64: 1, 128>}, {transform_indices = @transform_3, window_bounds = array<i64: 16, 128>}]} {
    %c0 = arith.constant 0 : index
    %c0_0 = arith.constant 0 : index
    %0 = vector.load %arg2[%c0, %c0_0] : memref<16x128xf32, #tpu.memory_space<vmem>>, vector<16x128xf32>
    %c0_1 = arith.constant 0 : index
    %c0_2 = arith.constant 0 : index
    %1 = vector.load %arg3[%c0_1, %c0_2] : memref<128x128xf32, #tpu.memory_space<vmem>>, vector<128x128xf32>
    %cst = arith.constant dense<0.000000e+00> : vector<16x128xf32>
    %2 = tpu.matmul %0, %1, %cst {dimension_numbers = #tpu.dot_dimension_numbers<[1], [1], [0], [0], [0, 0, 1, 0], [], []>} : vector<16x128xf32>, vector<128x128xf32>, vector<16x128xf32> -> vector<16x128xf32>
    %c128_i32 = arith.constant 128 : i32
    %3 = arith.muli %arg1, %c128_i32 : i32
    %4 = tpu.assume_multiple %3, 128 : i32
    %c0_3 = arith.constant 0 : index
    %5 = arith.index_cast %4 : i32 to index
    %6 = vector.load %arg2[%c0_3, %5] : memref<16x128xf32, #tpu.memory_space<vmem>>, vector<16x128xf32>
    %7 = arith.addf %2, %6 : vector<16x128xf32>
    %c0_4 = arith.constant 0 : index
    %c0_5 = arith.constant 0 : index
    %8 = vector.load %arg4[%c0_4, %c0_5] : memref<1x128xf32, #tpu.memory_space<vmem>>, vector<1x128xf32>
    %9 = vector.broadcast %8 : vector<1x128xf32> to vector<16x128xf32>
    %10 = arith.addf %7, %9 : vector<16x128xf32>
    %c0_6 = arith.constant 0 : index
    %c0_7 = arith.constant 0 : index
    %11 = vector.load %arg5[%c0_6, %c0_7] : memref<16x128xf32, #tpu.memory_space<vmem>>, vector<16x128xf32>
    tpu.vector_store %arg5[%c0_6, %c0_7], %10 {strides = array<i32>} : memref<16x128xf32, #tpu.memory_space<vmem>>, vector<16x128xf32>,
    return
  }
  func.func @transform_0(%arg0: i32, %arg1: i32) -> (i32, i32) {
    %c0_i32 = arith.constant 0 : i32
    %c0_i32_0 = arith.constant 0 : i32
    return %arg0, %c0_i32 : i32, i32
  }
  func.func @transform_1(%arg0: i32, %arg1: i32) -> (i32, i32) {
    %c0_i32 = arith.constant 0 : i32
    %c0_i32_0 = arith.constant 0 : i32
    return %arg1, %c0_i32 : i32, i32
  }
  func.func @transform_2(%arg0: i32, %arg1: i32) -> (i32, i32) {
    %c0_i32 = arith.constant 0 : i32
    %c0_i32_0 = arith.constant 0 : i32
    return %c0_i32, %arg1 : i32, i32
  }
  func.func @transform_3(%arg0: i32, %arg1: i32) -> (i32, i32) {
    %c0_i32 = arith.constant 0 : i32
    return %arg0, %arg1 : i32, i32
  }
}

</mosaic_0001>

<bundles_post_ra>
// kernel: tpu_custom_call.1
= control target key start
LH: loop header
LB: loop body
LE: loop exit
PB: predicated region body
PF: predicated region fallthrough
CT: control target
= control target key end

     0   :  { %8 = vsyncpa [#allocation3], 0  ;;  %s408_s0 = inlined_call_operand.hbm [shape: f32[16,128], index: 0, kind: input, shape index: {}]   ;;  %s409_s1 = inlined_call_operand.hbm [shape: f32[128,128], index: 1, kind: input, shape index: {}]   ;;  %s410_s2 = inlined_call_operand.vmem [shape: f32[1,128], index: 2, kind: input, shape index: {}]   ;;  %s411_s3 = inlined_call_operand.hbm [shape: f32[16,128], index: 3, kind: output, shape index: {}]  }
   0x1   :  { %9 = vsyncpa [#allocation6], 0 }
   0x2   :  { %10 = vsyncpa [#allocation4], 0  ;;  %s335_s12 = smov [#allocation2]   ;;  %s263_s16 = scalar_lea.hbm %s408_s0, 256 }
   0x3   :  { %s16_s13 = sshll.u32 %s335_s12, 4  ;;  %p264_p0 = scmp.ne.s32.totalorder %s408_s0, %s263_s16  ;;  %s17_s13 = int_to_ptr.vmem [resolvable:$true] %s16_s13 }
   0x4   :  { %p267_p1 = scmp.lt.u32.totalorder %s263_s16, %s408_s0 }
   0x6   :  { %p269_p2 = pnand %p267_p1, %p264_p0 }
   0x8   :  { %272 = shalt.err (!%p269_p2)
}
   0x9   :  { %s273_s21 = scalar_lea.vmem %s17_s13, 256  ;;  %p278_p4 = scmp.lt.s32.totalorder %s17_s13, %s17_s13 }
   0xa   :  { %p274_p3 = scmp.ne.s32.totalorder %s17_s13, %s273_s21  ;;  %p279_p5 = scmp.lt.s32.totalorder %s273_s21, %s273_s21 }
   0xc   :  { %p280_p6 = por %p279_p5, %p278_p4 }
   0xe   :  { %p281_p7 = pnand %p280_p6, %p274_p3 }
  0x10   :  { %284 = shalt.err (!%p281_p7)
}
  0x11   :  { %s336_s22 = smov 128   ;;  %s337_s23 = smov 8  }
  0x12   :  { %22 = dma.hbm_to_vmem [thread:$0]  %s408_s0, 256, %s17_s13, [#allocation3], %s336_s22, %s336_s22, %s337_s23  }
  0x13   :  { %s338_s26 = smov [#allocation5]   ;;  %s285_s30 = scalar_lea.hbm %s409_s1, 2048 }
  0x14   :  { %s28_s27 = sshll.u32 %s338_s26, 4  ;;  %p286_p8 = scmp.ne.s32.totalorder %s409_s1, %s285_s30  ;;  %s29_s27 = int_to_ptr.vmem [resolvable:$true] %s28_s27 }
  0x15   :  { %p289_p9 = scmp.lt.u32.totalorder %s285_s30, %s409_s1 }
  0x17   :  { %p291_p10 = pnand %p289_p9, %p286_p8 }
  0x19   :  { %294 = shalt.err (!%p291_p10)
}
  0x1a   :  { %s295_s8 = scalar_lea.vmem %s29_s27, 2048  ;;  %p300_p12 = scmp.lt.s32.totalorder %s29_s27, %s29_s27 }
  0x1b   :  { %p296_p11 = scmp.ne.s32.totalorder %s29_s27, %s295_s8  ;;  %p301_p13 = scmp.lt.s32.totalorder %s295_s8, %s295_s8 }
  0x1d   :  { %p302_p0 = por %p301_p13, %p300_p12 }
  0x1f   :  { %p303_p1 = pnand %p302_p0, %p296_p11 }
  0x21   :  { %306 = shalt.err (!%p303_p1)
}
  0x22   :  { %34 = dma.hbm_to_vmem [thread:$0]  %s409_s1, 2048, %s29_s27, [#allocation6], %s336_s22, %s336_s22, %s337_s23  }
  0x23   :  { %329 = dma.done.wait [#allocation3], 256  }
  0x24   :  { %330 = vsyncadd [#allocation3], 4294967040 }
  0x25   :  { %331 = dma.done.wait [#allocation6], 2048  }
  0x26   :  { %332 = vsyncadd [#allocation6], 4294965248  ;;  %v45_v0 = vld [vmem:[#allocation5] sm:$0xff]  ;;  %v46_v1 = vld [vmem:[#allocation5 + $0x8] sm:$0xff]  ;;  %s339_s11 = smov [#allocation7]  }
  0x27   :  { %v47_v2 = vld [vmem:[#allocation5 + $0x10] sm:$0xff]  ;;  %v226_v3 = vpack.c.bf16 %v46_v1, %v45_v0  ;;  %v48_v4 = vld [vmem:[#allocation5 + $0x18] sm:$0xff]  ;;  %v49_v7 = vld [vmem:[#allocation5 + $0x20] sm:$0xff]  ;;  %s158_s12 = sshll.u32 %s339_s11, 4  ;;  %s159_s12 = int_to_ptr.vmem [resolvable:$true] %s158_s12 }
  0x28   :  { %v230_v5 = vpack.c.bf16 %v48_v4, %v47_v2  ;;  %v43_v6 = vld [vmem:[#allocation2] sm:$0xff]  ;;  %v50_v8 = vld [vmem:[#allocation5 + $0x28] sm:$0xff]  ;;  %v52_v11 = vld [vmem:[#allocation5 + $0x38] sm:$0xff]  ;;  %s307_s13 = scalar_lea.vmem %s159_s12, 256  ;;  %p312_p3 = scmp.lt.s32.totalorder %s159_s12, %s159_s12 }
  0x29   :  { %227 = vmatprep.subr.bf16.mxu0 %v226_v3  ;;  %223 = vmatprep.mubr.f32.mxu0 %v43_v6  ;;  %v234_v9 = vpack.c.bf16 %v50_v8, %v49_v7  ;;  %v51_v10 = vld [vmem:[#allocation5 + $0x30] sm:$0xff]  ;;  %v53_v13 = vld [vmem:[#allocation5 + $0x40] sm:$0xff]  ;;  %v54_v14 = vld [vmem:[#allocation5 + $0x48] sm:$0xff]  ;;  %p308_p2 = scmp.ne.s32.totalorder %s159_s12, %s307_s13  ;;  %p313_p4 = scmp.lt.s32.totalorder %s307_s13, %s307_s13 }
  0x2a   :  { %229 = vmatpush3.bf16.xpose.msra.mxu0 %v226_v3  ;;  %v238_v12 = vpack.c.bf16 %v52_v11, %v51_v10  ;;  %v242_v15 = vpack.c.bf16 %v54_v14, %v53_v13  ;;  %v55_v16 = vld [vmem:[#allocation5 + $0x50] sm:$0xff]  ;;  %v56_v17 = vld [vmem:[#allocation5 + $0x58] sm:$0xff]  ;;  %v57_v19 = vld [vmem:[#allocation5 + $0x60] sm:$0xff] }
  0x2b   :  { %231 = vmatprep.subr.bf16.mxu0 %v230_v5  ;;  %v246_v18 = vpack.c.bf16 %v56_v17, %v55_v16  ;;  %v58_v20 = vld [vmem:[#allocation5 + $0x68] sm:$0xff]  ;;  %v59_v22 = vld [vmem:[#allocation5 + $0x70] sm:$0xff]  ;;  %v60_v23 = vld [vmem:[#allocation5 + $0x78] sm:$0xff]  ;;  %p314_p5 = por %p313_p4, %p312_p3 }
  0x2c   :  { %v250_v21 = vpack.c.bf16 %v58_v20, %v57_v19  ;;  %v254_v24 = vpack.c.bf16 %v60_v23, %v59_v22  ;;  %v44_v25 = vld [vmem:[#allocation2 + $0x8] sm:$0xff]  ;;  %v172_v27 = vld [vmem:[%s410_s2] ss:$0 sm:$0xff] }
  0x2d   :  { %p315_p6 = pnand %p314_p5, %p308_p2 }
  0x32   :  { %233 = vmatpush3.bf16.xpose.msra.mxu0 %v230_v5 }
  0x33   :  { %235 = vmatprep.subr.bf16.mxu0 %v234_v9 }
  0x3a   :  { %237 = vmatpush3.bf16.xpose.msra.mxu0 %v234_v9 }
  0x3b   :  { %239 = vmatprep.subr.bf16.mxu0 %v238_v12 }
  0x42   :  { %241 = vmatpush3.bf16.xpose.msra.mxu0 %v238_v12 }
  0x43   :  { %243 = vmatprep.subr.bf16.mxu0 %v242_v15 }
  0x4a   :  { %245 = vmatpush3.bf16.xpose.msra.mxu0 %v242_v15 }
  0x4b   :  { %247 = vmatprep.subr.bf16.mxu0 %v246_v18 }
  0x52   :  { %249 = vmatpush3.bf16.xpose.msra.mxu0 %v246_v18 }
  0x53   :  { %251 = vmatprep.subr.bf16.mxu0 %v250_v21 }
  0x5a   :  { %253 = vmatpush3.bf16.xpose.msra.mxu0 %v250_v21 }
  0x5b   :  { %255 = vmatprep.subr.bf16.mxu0 %v254_v24 }
  0x62   :  { %257 = vmatpush3.bf16.xpose.msra.mxu0 %v254_v24 }
  0x69   :  { %224 = vmatmul.mubr.f32.vlgmr.msra.gmra.mrb[0].mxu0 %v44_v25 }
 0x13c   :  { %v225_v26 = vpop.f32.mrb[0].mxu0 }
 0x13d   :  { %v139_v28 = vadd.f32 %v225_v26, %v44_v25  ;;  %v133_v29 = vpop.f32.mrb[1].mxu0 }
 0x13e   :  { %v134_v30 = vadd.f32 %v133_v29, %v43_v6 }
 0x13f   :  { %v150_v31 = vadd.f32 %v172_v27, %v139_v28 }
 0x140   :  { %v149_v32 = vadd.f32 %v172_v27, %v134_v30 }
 0x141   :  { %152 = vst [vmem:[#allocation7 + $0x8] sm:$0xff] %v150_v31 }
 0x142   :  { %151 = vst [vmem:[#allocation7] sm:$0xff] %v149_v32 }
 0x143   :  { %318 = shalt.err (!%p315_p6)
}
 0x144   :  { %s319_s2 = scalar_lea.hbm %s411_s3, 256 }
 0x145   :  { %p320_p7 = scmp.ne.s32.totalorder %s411_s3, %s319_s2  ;;  %p323_p8 = scmp.lt.u32.totalorder %s319_s2, %s411_s3 }
 0x147   :  { %p325_p9 = pnand %p323_p8, %p320_p7 }
 0x149   :  { %328 = shalt.err (!%p325_p9)
}
 0x14a   :  { %164 = dma.vmem_to_hbm [thread:$0]  %s159_s12, 256, %s411_s3, [#allocation4], %s336_s22, %s336_s22, %s337_s23  }
 0x14b   :  { %333 = dma.done.wait [#allocation4], 256  }
 0x14c   :  { %334 = vsyncadd [#allocation4], 4294967040 }
 0x14d   :  { %168 = vsyncpa [#allocation3], 1 }
 0x14e   :  { %169 = vsyncpa [#allocation6], 1 }
 0x14f   :  { %170 = vsyncpa [#allocation4], 1 }

</bundles_post_ra>
